<compile_context>
chip_gen: v6e
topology: v6e:2x2x1
jax: 0.10.0
libtpu: 0.0.40
codegen_flags: <defaults>
</compile_context>

<pallas_src>
import jax
import jax.numpy as jnp
from jax.experimental import pallas as pl
from jax.experimental.pallas import tpu as pltpu


def caps_primary_kernel(p_ref, w_ref, b_ref, s_ref, o_ref, acc_ref):
    # p_ref:   (TR, TF) bf16 im2col patch tile (rows = flattened batch*spatial)
    # w_ref:   (TF, C)  bf16 flattened conv-weight tile, C = cap_dim * num_cap_map
    # b_ref:   (1, C)   f32 conv bias
    # s_ref:   (C, M)   bf16 one-hot selection: S[c, m] = 1 iff c % M == m
    # o_ref:   (TR, C)  squashed capsule output (channel c = d*M + m)
    # acc_ref: (TR, C)  f32 conv accumulator, carried across the F grid axis
    k = pl.program_id(1)

    @pl.when(k == 0)
    def _init():
        acc_ref[...] = jnp.zeros_like(acc_ref)

    acc_ref[...] += jnp.dot(p_ref[...], w_ref[...],
                            preferred_element_type=jnp.float32)

    @pl.when(k == pl.num_programs(1) - 1)
    def _finalize():
        conv = acc_ref[...] + b_ref[...]                              # (TR, C) f32
        # Per-(row, map) squared norm over the capsule dim d: the strided
        # reduction becomes a single MXU matmul against the one-hot selection.
        sqnorm = jnp.dot((conv * conv).astype(jnp.bfloat16), s_ref[...],
                         preferred_element_type=jnp.float32)          # (TR, M)
        # squash scale = sqnorm / ((1 + sqnorm) * sqrt(sqnorm + eps));
        # rsqrt + approx reciprocal go to the EUP slot (co-issue with VPU/MXU).
        scale = (sqnorm * jax.lax.rsqrt(sqnorm + 1e-7)
                 ) * pl.reciprocal(1.0 + sqnorm, approx=True)
        # Column c = d*M + m takes scale[:, c % M]: lane tiling, no transpose,
        # no second matmul.
        cap_dim = o_ref.shape[-1] // s_ref.shape[-1]
        o_ref[...] = (conv * jnp.tile(scale, (1, cap_dim))).astype(o_ref.dtype)


def _im2col_nhwc(x_nchw, K, stride, dtype=jnp.bfloat16):
    """(B, Cin, H, W) -> patches (B, P, F) in `dtype`; F index = (ki*K+kj)*Cin + c."""
    B, C, H, W = x_nchw.shape
    oh = (H - K) // stride + 1
    ow = (W - K) // stride + 1
    # Single NCHW->NHWC pass; cast *here* so the ~K^2 im2col blow-up is written
    # to HBM once, already in bf16 (halves pre-kernel HBM traffic).
    x = jnp.transpose(x_nchw, (0, 2, 3, 1)).astype(dtype)
    cols = [x[:, ki:ki + stride * oh:stride, kj:kj + stride * ow:stride, :]
            for ki in range(K) for kj in range(K)]
    patches = jnp.stack(cols, axis=3)                       # (B, oh, ow, K*K, Cin)
    return patches.reshape(B, oh * ow, K * K * C), oh, ow   # (B, P, F)


def _chip_info():
    """(vmem_capacity_bytes, tensorcore_count), with conservative fallbacks."""
    vmem_cap = 64 * 1024 * 1024          # v7x per-TC floor (most restrictive)
    cores = 2                            # assume megacore; only affects padding
    try:
        info = pltpu.get_tpu_info()
        vmem_cap = int(getattr(info, "vmem_capacity_bytes", vmem_cap))
        for attr in ("num_cores", "core_count", "num_tensorcores",
                     "tensorcore_count"):
            val = getattr(info, attr, None)
            if val:
                cores = int(val)
                break
    except Exception:                    # not queryable: keep conservative defaults
        pass
    return vmem_cap, cores


def _pick_row_tiling(rows, vmem_cap, cores):
    """Return (tile_rows, rows_pad).

    Small problems: one full-rows tile (block == full dim, so no (8,128)
    constraint, no padding, and no forced split on single-TC chips).
    Large problems: 512-row tiles (1024 when VMEM allows), tile count rounded
    up to a multiple of the TensorCore count so v7x megacore stays balanced.
    """
    if rows <= 512:
        if cores > 1 and rows >= 256 and rows % 16 == 0:
            return rows // 2, rows       # two equal tiles, still no padding
        return rows, rows
    tile = 1024 if (vmem_cap >= 100 * 1024 * 1024 and rows >= 8192) else 512
    n = pl.cdiv(rows, tile)
    if cores > 1:
        n = -(-n // cores) * cores
    return tile, n * tile


def _pick_f_tiling(F):
    """Return (tile_f, F_pad): single step for small F, 2048-wide steps else."""
    if F <= 4096:
        return F, F                      # block == full dim, no padding needed
    tile_f = 2048                        # multiple of (8, 128) tiling constraints
    n = pl.cdiv(F, tile_f)
    return tile_f, n * tile_f


def caps_primary_layer(x, weight, bias, *, kernel_size, stride, cap_dim,
                       num_cap_map, out_dtype=jnp.float32):
    """Forward pass matching the PyTorch CapsPrimaryLayer.

    x:      (B, Cin, H, W)  float32
    weight: (Cout, Cin, K, K), Cout = cap_dim * num_cap_map
    bias:   (Cout,)
    returns (B, num_cap_map, outH*outW, cap_dim)
    """
    B = x.shape[0]
    C_out, C_in, K, _ = weight.shape
    assert C_out == cap_dim * num_cap_map

    patches, oh, ow = _im2col_nhwc(x, kernel_size, stride)      # (B, P, F) bf16
    P = oh * ow
    F = patches.shape[-1]
    rows = B * P

    vmem_cap, cores = _chip_info()
    tile_rows, rows_pad = _pick_row_tiling(rows, vmem_cap, cores)
    tile_f, f_pad = _pick_f_tiling(F)
    num_row_tiles = rows_pad // tile_rows
    num_f_tiles = f_pad // tile_f

    # Flatten batch into the row axis; pad only when the tiling doesn't divide
    # exactly (never for the small shapes below), once, in bf16.
    patches_flat = patches.reshape(rows, F)
    if rows_pad != rows or f_pad != F:
        patches_flat = jnp.pad(patches_flat,
                               ((0, rows_pad - rows), (0, f_pad - F)))

    # Weight rows reordered to match the (ki, kj, c) feature order of the patches.
    w_flat = jnp.transpose(weight, (2, 3, 1, 0)).reshape(K * K * C_in, C_out)
    w_flat = w_flat.astype(jnp.bfloat16)
    if f_pad != F:
        w_flat = jnp.pad(w_flat, ((0, f_pad - F), (0, 0)))
    b_row = bias.reshape(1, C_out).astype(jnp.float32)
    sel = (jnp.arange(C_out)[:, None] % num_cap_map
           == jnp.arange(num_cap_map)[None, :]).astype(jnp.bfloat16)  # (C, M)

    out_bytes = jnp.dtype(out_dtype).itemsize
    # Per-step VMEM residency: double-buffered patch/weight/output blocks plus
    # the f32 accumulator scratch and the tiny bias / selection blocks.
    patch_blk = tile_rows * tile_f * 2
    w_blk = tile_f * C_out * 2
    out_blk = tile_rows * C_out * out_bytes
    small_blk = C_out * 4 + C_out * num_cap_map * 2
    acc_blk = tile_rows * C_out * 4
    vmem_need = 2 * (patch_blk + w_blk + out_blk + small_blk) + acc_blk
    vmem_limit = int(min(max(2 * vmem_need, 32 * 1024 * 1024),
                         max(vmem_cap - 8 * 1024 * 1024, 32 * 1024 * 1024)))

    cost = pl.CostEstimate(
        flops=(2 * rows_pad * f_pad * C_out
               + 2 * rows_pad * C_out * num_cap_map
               + 6 * rows_pad * C_out),
        transcendentals=2 * rows_pad * num_cap_map,
        bytes_accessed=(patches_flat.size * 2
                        + w_flat.size * 2 * num_row_tiles
                        + b_row.size * 4 + sel.size * 2
                        + rows_pad * C_out * out_bytes),
    )

    out_flat = pl.pallas_call(
        caps_primary_kernel,
        out_shape=jax.ShapeDtypeStruct((rows_pad, C_out), out_dtype),
        grid_spec=pltpu.PrefetchScalarGridSpec(
            num_scalar_prefetch=0,
            grid=(num_row_tiles, num_f_tiles),          # reduction (F) axis last
            in_specs=[
                pl.BlockSpec((tile_rows, tile_f), lambda r, k: (r, k)),
                pl.BlockSpec((tile_f, C_out), lambda r, k: (k, 0)),
                pl.BlockSpec((1, C_out), lambda r, k: (0, 0)),
                pl.BlockSpec((C_out, num_cap_map), lambda r, k: (0, 0)),
            ],
            out_specs=pl.BlockSpec((tile_rows, C_out), lambda r, k: (r, 0)),
            scratch_shapes=[pltpu.VMEM((tile_rows, C_out), jnp.float32)],
        ),
        compiler_params=pltpu.CompilerParams(
            dimension_semantics=("parallel", "arbitrary"),
            vmem_limit_bytes=vmem_limit),
        cost_estimate=cost,
    )(patches_flat, w_flat, b_row, sel)

    # Channel c = d*M + m  ->  (B, P, D, M) -> (B, M, P, D) to match the module.
    # TODO(synk): a fused downstream kernel could consume the lane-dense
    # (rows, C) output directly and fold this permutation into its index_map.
    out = out_flat[:rows].reshape(B, P, cap_dim, num_cap_map)
    return jnp.transpose(out, (0, 3, 1, 2))


def _reference(x, weight, bias, *, kernel_size, stride, cap_dim, num_cap_map):
    """Pure-JAX (f32) replica of the PyTorch forward, for numerical checking."""
    conv = jax.lax.conv_general_dilated(
        x, weight, window_strides=(stride, stride), padding="VALID",
        dimension_numbers=("NCHW", "OIHW", "NCHW"))
    conv = conv + bias[None, :, None, None]
    B, C, oh, ow = conv.shape
    out = conv.reshape(B, cap_dim, num_cap_map, oh * ow)
    out = out.transpose(0, 2, 3, 1)                                # (B, M, P, D)
    sqnorm = jnp.sum(out * out, axis=-1, keepdims=True)
    safe_norm = jnp.sqrt(sqnorm + 1e-7)
    return (sqnorm / (1.0 + sqnorm)) * (out / safe_norm)


if __name__ == "__main__":
    # Small, module-consistent shapes.
    batch, in_channels, H, W = 2, 4, 16, 16
    cap_dim, num_cap_map = 8, 4
    out_channels = cap_dim * num_cap_map          # 32
    kernel_size, stride = 3, 2                    # -> map_dim = 7, P = 49

    key = jax.random.PRNGKey(0)
    kx, kw, kb = jax.random.split(key, 3)
    x = jax.random.normal(kx, (batch, in_channels, H, W), dtype=jnp.float32)
    fan_in = in_channels * kernel_size * kernel_size
    weight = jax.random.normal(
        kw, (out_channels, in_channels, kernel_size, kernel_size),
        dtype=jnp.float32) * (1.0 / jnp.sqrt(fan_in))
    bias = jax.random.normal(kb, (out_channels,), dtype=jnp.float32) * 0.1

    out = caps_primary_layer(
        x, weight, bias, kernel_size=kernel_size, stride=stride,
        cap_dim=cap_dim, num_cap_map=num_cap_map)
    out = jax.block_until_ready(out)

    ref = _reference(
        x, weight, bias, kernel_size=kernel_size, stride=stride,
        cap_dim=cap_dim, num_cap_map=num_cap_map)
    assert out.shape == (batch, num_cap_map, 49, cap_dim), out.shape
    # bf16 matmul operands + bf16 one-hot norm + EUP approx reciprocal
    # -> relaxed tolerance vs the pure-f32 reference.
    err = float(jnp.max(jnp.abs(out - ref)))
    assert jnp.allclose(out, ref, atol=2e-2, rtol=2e-2), err

    print("KERNEL_OK")
</pallas_src>

<mosaic_0001>
module attributes {stable_mosaic.version = 11 : i64} {
  func.func @caps_primary_kernel(%arg0: i32, %arg1: i32, %arg2: memref<98x36xbf16, #tpu.memory_space<vmem>>, %arg3: memref<36x32xbf16, #tpu.memory_space<vmem>>, %arg4: memref<1x32xf32, #tpu.memory_space<vmem>>, %arg5: memref<32x4xbf16, #tpu.memory_space<vmem>>, %arg6: memref<98x32xf32, #tpu.memory_space<vmem>>, %arg7: memref<98x32xf32, #tpu.memory_space<vmem>>) attributes {dimension_semantics = [#tpu.dimension_semantics<parallel>, #tpu.dimension_semantics<arbitrary>], iteration_bounds = array<i64: 1, 1>, scalar_prefetch = 0 : i64, scratch_operands = 1 : i64, tpu.core_type = #tpu.core_type<tc>, window_params = [{transform_indices = @transform_0, window_bounds = array<i64: 98, 36>}, {transform_indices = @transform_1, window_bounds = array<i64: 36, 32>}, {pipeline_mode = #tpu.pipeline_mode<synchronous>, transform_indices = @transform_2, window_bounds = array<i64: 1, 32>}, {pipeline_mode = #tpu.pipeline_mode<synchronous>, transform_indices = @transform_3, window_bounds = array<i64: 32, 4>}, {transform_indices = @transform_4, window_bounds = array<i64: 98, 32>}]} {
    %c0_i32 = arith.constant 0 : i32
    %0 = arith.cmpi eq, %arg1, %c0_i32 : i32
    %1 = arith.extui %0 : i1 to i32
    %c0_i32_0 = arith.constant 0 : i32
    %2 = arith.cmpi ne, %1, %c0_i32_0 : i32
    scf.if %2 {
      %cst_10 = arith.constant 0.000000e+00 : f32
      %12 = vector.broadcast %cst_10 : f32 to vector<98x32xf32>
      %c0_11 = arith.constant 0 : index
      %c0_12 = arith.constant 0 : index
      %13 = vector.load %arg7[%c0_11, %c0_12] : memref<98x32xf32, #tpu.memory_space<vmem>>, vector<98x32xf32>
      tpu.vector_store %arg7[%c0_11, %c0_12], %12 {strides = array<i32>} : memref<98x32xf32, #tpu.memory_space<vmem>>, vector<98x32xf32>,
    } else {
    }
    %c0 = arith.constant 0 : index
    %c0_1 = arith.constant 0 : index
    %3 = vector.load %arg7[%c0, %c0_1] : memref<98x32xf32, #tpu.memory_space<vmem>>, vector<98x32xf32>
    %c0_2 = arith.constant 0 : index
    %c0_3 = arith.constant 0 : index
    %4 = vector.load %arg2[%c0_2, %c0_3] : memref<98x36xbf16, #tpu.memory_space<vmem>>, vector<98x36xbf16>
    %c0_4 = arith.constant 0 : index
    %c0_5 = arith.constant 0 : index
    %5 = vector.load %arg3[%c0_4, %c0_5] : memref<36x32xbf16, #tpu.memory_space<vmem>>, vector<36x32xbf16>
    %cst = arith.constant dense<0.000000e+00> : vector<98x32xf32>
    %6 = tpu.matmul %4, %5, %cst {dimension_numbers = #tpu.dot_dimension_numbers<[1], [0], [0], [1], [0, 0, 1, 1], [], []>} : vector<98x36xbf16>, vector<36x32xbf16>, vector<98x32xf32> -> vector<98x32xf32>
    %7 = arith.addf %3, %6 : vector<98x32xf32>
    %c0_6 = arith.constant 0 : index
    %c0_7 = arith.constant 0 : index
    %8 = vector.load %arg7[%c0_6, %c0_7] : memref<98x32xf32, #tpu.memory_space<vmem>>, vector<98x32xf32>
    tpu.vector_store %arg7[%c0_6, %c0_7], %7 {strides = array<i32>} : memref<98x32xf32, #tpu.memory_space<vmem>>, vector<98x32xf32>,
    %c0_i32_8 = arith.constant 0 : i32
    %9 = arith.cmpi eq, %arg1, %c0_i32_8 : i32
    %10 = arith.extui %9 : i1 to i32
    %c0_i32_9 = arith.constant 0 : i32
    %11 = arith.cmpi ne, %10, %c0_i32_9 : i32
    scf.if %11 {
      %c0_10 = arith.constant 0 : index
      %c0_11 = arith.constant 0 : index
      %12 = vector.load %arg7[%c0_10, %c0_11] : memref<98x32xf32, #tpu.memory_space<vmem>>, vector<98x32xf32>
      %c0_12 = arith.constant 0 : index
      %c0_13 = arith.constant 0 : index
      %13 = vector.load %arg4[%c0_12, %c0_13] : memref<1x32xf32, #tpu.memory_space<vmem>>, vector<1x32xf32>
      %14 = vector.broadcast %13 : vector<1x32xf32> to vector<98x32xf32>
      %15 = arith.addf %12, %14 : vector<98x32xf32>
      %16 = arith.mulf %15, %15 : vector<98x32xf32>
      %17 = arith.truncf %16 : vector<98x32xf32> to vector<98x32xbf16>
      %c0_14 = arith.constant 0 : index
      %c0_15 = arith.constant 0 : index
      %18 = vector.load %arg5[%c0_14, %c0_15] : memref<32x4xbf16, #tpu.memory_space<vmem>>, vector<32x4xbf16>
      %cst_16 = arith.constant dense<0.000000e+00> : vector<98x4xf32>
      %19 = tpu.matmul %17, %18, %cst_16 {dimension_numbers = #tpu.dot_dimension_numbers<[1], [0], [0], [1], [0, 0, 1, 1], [], []>} : vector<98x32xbf16>, vector<32x4xbf16>, vector<98x4xf32> -> vector<98x4xf32>
      %cst_17 = arith.constant 1.000000e-07 : f32
      %20 = vector.broadcast %cst_17 : f32 to vector<98x4xf32>
      %21 = arith.addf %19, %20 : vector<98x4xf32>
      %22 = math.rsqrt %21 : vector<98x4xf32>
      %23 = arith.mulf %19, %22 : vector<98x4xf32>
      %cst_18 = arith.constant 1.000000e+00 : f32
      %24 = vector.broadcast %cst_18 : f32 to vector<98x4xf32>
      %25 = arith.addf %24, %19 : vector<98x4xf32>
      %26 = tpu.reciprocal %25 {approx = true} : vector<98x4xf32> -> vector<98x4xf32>
      %27 = arith.mulf %23, %26 : vector<98x4xf32>
      %28 = tpu.concatenate %27, %27, %27, %27, %27, %27, %27, %27 in 1 : vector<98x4xf32>, vector<98x4xf32>, vector<98x4xf32>, vector<98x4xf32>, vector<98x4xf32>, vector<98x4xf32>, vector<98x4xf32>, vector<98x4xf32> -> vector<98x32xf32>
      %29 = arith.mulf %15, %28 : vector<98x32xf32>
      %c0_19 = arith.constant 0 : index
      %c0_20 = arith.constant 0 : index
      %30 = vector.load %arg6[%c0_19, %c0_20] : memref<98x32xf32, #tpu.memory_space<vmem>>, vector<98x32xf32>
      tpu.vector_store %arg6[%c0_19, %c0_20], %29 {strides = array<i32>} : memref<98x32xf32, #tpu.memory_space<vmem>>, vector<98x32xf32>,
    } else {
    }
    return
  }
  func.func @transform_0(%arg0: i32, %arg1: i32) -> (i32, i32) {
    %c0_i32 = arith.constant 0 : i32
    return %arg0, %arg1 : i32, i32
  }
  func.func @transform_1(%arg0: i32, %arg1: i32) -> (i32, i32) {
    %c0_i32 = arith.constant 0 : i32
    %c0_i32_0 = arith.constant 0 : i32
    return %arg1, %c0_i32 : i32, i32
  }
  func.func @transform_2(%arg0: i32, %arg1: i32) -> (i32, i32) {
    %c0_i32 = arith.constant 0 : i32
    %c0_i32_0 = arith.constant 0 : i32
    %c0_i32_1 = arith.constant 0 : i32
    return %c0_i32, %c0_i32_0 : i32, i32
  }
  func.func @transform_3(%arg0: i32, %arg1: i32) -> (i32, i32) {
    %c0_i32 = arith.constant 0 : i32
    %c0_i32_0 = arith.constant 0 : i32
    %c0_i32_1 = arith.constant 0 : i32
    return %c0_i32, %c0_i32_0 : i32, i32
  }
  func.func @transform_4(%arg0: i32, %arg1: i32) -> (i32, i32) {
    %c0_i32 = arith.constant 0 : i32
    %c0_i32_0 = arith.constant 0 : i32
    return %arg0, %c0_i32 : i32, i32
  }
}

</mosaic_0001>

<bundles_post_ra>
// kernel: tpu_custom_call.1
= control target key start
LH: loop header
LB: loop body
LE: loop exit
PB: predicated region body
PF: predicated region fallthrough
CT: control target
= control target key end

     0   :  { %vm138_vm0 = vcmask 1041408   ;;  %v1116_v0 = vmov 0.0   ;;  %vm1117_vm1 = vmmov 0   ;;  %vm22_vm2 = vcmask 261120   ;;  %s1119_s12 = smov 4   ;;  %s1120_s13 = smov 16   ;;  %s1769_s1 = inlined_call_operand.vmem [shape: bf16[36,32], index: 1, kind: input, shape index: {}]   ;;  %s1770_s0 = inlined_call_operand.vmem [shape: bf16[98,36], index: 0, kind: input, shape index: {}]   ;;  %s1771_s3 = inlined_call_operand.vmem [shape: bf16[32,4], index: 3, kind: input, shape index: {}]   ;;  %s1772_s2 = inlined_call_operand.vmem [shape: f32[1,32], index: 2, kind: input, shape index: {}]   ;;  %s1773_s4 = inlined_call_operand.vmem [shape: f32[98,32], index: 4, kind: output, shape index: {}]  }
   0x1   :  { %977 = vmatprep.subr.bf16.mxu0 %v1116_v0  ;;  %v1052_v1 = vld [vmem:[%s1769_s1 + $0x10] ss:$0 sps:$4 sm:$0x33]   ;;  %983 = vmatprep.mubr.msk.bf16.mxu0 %vm1117_vm1, %v1116_v0  ;;  %v1053_v3 = vld [vmem:[%s1769_s1 + $0x8] sm:$0xff]   ;;  %23 = vst.msk [vmem:[#allocation2] sm:$0xff] %vm22_vm2, %v1116_v0  ;;  %24 = vst.msk [vmem:[#allocation2 + $0x8] sm:$0xff] %vm22_vm2, %v1116_v0 }
   0x2   :  { %1011 = vmatprep.subr.bf16.mxu1 %v1116_v0  ;;  %1015 = vmatprep.mubr.msk.bf16.mxu1 %vm1117_vm1, %v1116_v0  ;;  %v140_v2 = vsel %vm138_vm0, %v1052_v1, 0  ;;  %25 = vst.msk [vmem:[#allocation2 + $0x10] sm:$0xff] %vm22_vm2, %v1116_v0  ;;  %26 = vst.msk [vmem:[#allocation2 + $0x18] sm:$0xff] %vm22_vm2, %v1116_v0  ;;  %v1054_v4 = vld [vmem:[%s1769_s1] sm:$0xff]   ;;  %vm116_vm3 = vcmask 293888   ;;  %v1056_v6 = vld [vmem:[%s1770_s0 + $0x8] sm:$0xff]  }
   0x3   :  { %978 = vmatpush3.bf16.msra.mxu0 %v140_v2  ;;  %27 = vst.msk [vmem:[#allocation2 + $0x20] sm:$0xff] %vm22_vm2, %v1116_v0  ;;  %28 = vst.msk [vmem:[#allocation2 + $0x28] sm:$0xff] %vm22_vm2, %v1116_v0  ;;  %v1055_v5 = vld [vmem:[%s1770_s0] sm:$0xff]   ;;  %v1057_v7 = vld [vmem:[%s1770_s0 + $0x10] sm:$0xff]   ;;  %vm35_vm4 = vcmask 254976   ;;  %s1121_s14 = smov 12  }
   0x4   :  { %979 = vmatprep.subr.bf16.mxu0 %v1116_v0  ;;  %29 = vst.msk [vmem:[#allocation2 + $0x30] sm:$0xff] %vm22_vm2, %v1116_v0  ;;  %30 = vst.msk [vmem:[#allocation2 + $0x38] sm:$0xff] %vm22_vm2, %v1116_v0  ;;  %v1058_v8 = vld [vmem:[%s1770_s0 + $0x18] sm:$0xff]   ;;  %v1059_v9 = vld [vmem:[%s1770_s0 + $0x20] sm:$0xff]   ;;  %s1122_s15 = smov 24   ;;  %s1123_s16 = smov 20  }
   0x5   :  { %31 = vst.msk [vmem:[#allocation2 + $0x40] sm:$0xff] %vm22_vm2, %v1116_v0  ;;  %32 = vst.msk [vmem:[#allocation2 + $0x48] sm:$0xff] %vm22_vm2, %v1116_v0  ;;  %v1060_v10 = vld [vmem:[%s1770_s0 + $0x28] sm:$0xff]   ;;  %v1061_v11 = vld [vmem:[%s1770_s0 + $0x30] ss:$0 sps:$4 sm:$0x11]  }
   0x6   :  { %33 = vst.msk [vmem:[#allocation2 + $0x50] sm:$0xff] %vm22_vm2, %v1116_v0  ;;  %34 = vst.msk [vmem:[#allocation2 + $0x58] sm:$0xff] %vm22_vm2, %v1116_v0  ;;  %v1062_v12 = vld [vmem:[%s1771_s3 + $0x8] sm:$0xff]   ;;  %v1063_v13 = vld [vmem:[%s1771_s3] sm:$0xff]   ;;  %s1124_s17 = smov 28   ;;  %vm803_vm5 = vcmask 31744  }
   0x7   :  { %980 = vmatpush3.bf16.msra.mxu0 %v1053_v3  ;;  %1012 = vmatpush3.bf16.msra.mxu1 %v1062_v12  ;;  %36 = vst.msk [vmem:[#allocation2 + $0x60] sm:$0x3] %vm35_vm4, %v1116_v0  ;;  %v1245_v28 = vld [vmem:[%s1772_s2] ss:$0 sm:$0xff]  ;;  %s1118_s2 = smov 8   ;;  %vm817_vm6 = vcmask 64512  }
   0x8   :  { %981 = vmatprep.subr.bf16.mxu0 %v1116_v0  ;;  %1013 = vmatprep.subr.bf16.mxu1 %v1116_v0  ;;  %v37_v14 = vld [vmem:[#allocation2] sm:$0xff]  ;;  %v38_v18 = vld [vmem:[#allocation2 + $0x8] sm:$0xff]  ;;  %vm831_vm7 = vcmask 97280   ;;  %vm845_vm8 = vcmask 130048   ;;  %vm859_vm9 = vcmask 162816   ;;  %vm873_vm10 = vcmask 195584  }
   0x9   :  { %v39_v22 = vld [vmem:[#allocation2 + $0x10] sm:$0xff]  ;;  %v40_v26 = vld [vmem:[#allocation2 + $0x18] sm:$0xff]  ;;  %vm887_vm11 = vcmask 228352  }
   0xa   :  { %v41_v34 = vld [vmem:[#allocation2 + $0x20] sm:$0xff]  ;;  %v42_v42 = vld [vmem:[#allocation2 + $0x28] sm:$0xff] }
   0xb   :  { %982 = vmatpush3.bf16.msra.mxu0 %v1054_v4  ;;  %1014 = vmatpush3.bf16.msra.mxu1 %v1063_v13  ;;  %v43_v49 = vld [vmem:[#allocation2 + $0x30] sm:$0xff]  ;;  %v44_v57 = vld [vmem:[#allocation2 + $0x38] sm:$0xff] }
   0xc   :  { %v45_v1 = vld [vmem:[#allocation2 + $0x40] sm:$0xff] }
   0xe   :  { %984 = vmatmul.mubr.msk.bf16.vlgmr.msra.gmra.mxu0 %vm116_vm3, %v1055_v5 }
   0xf   :  { %987 = vmatprep.mubr.msk.bf16.mxu0 %vm1117_vm1, %v1116_v0 }
  0x16   :  { %988 = vmatmul.mubr.msk.bf16.gmra.mxu0 %vm116_vm3, %v1056_v6 }
  0x17   :  { %991 = vmatprep.mubr.msk.bf16.mxu0 %vm1117_vm1, %v1116_v0 }
  0x1e   :  { %992 = vmatmul.mubr.msk.bf16.gmra.mxu0 %vm116_vm3, %v1057_v7 }
  0x1f   :  { %995 = vmatprep.mubr.msk.bf16.mxu0 %vm1117_vm1, %v1116_v0 }
  0x26   :  { %996 = vmatmul.mubr.msk.bf16.gmra.mxu0 %vm116_vm3, %v1058_v8 }
  0x27   :  { %999 = vmatprep.mubr.msk.bf16.mxu0 %vm1117_vm1, %v1116_v0 }
  0x2e   :  { %1000 = vmatmul.mubr.msk.bf16.gmra.mxu0 %vm116_vm3, %v1059_v9  ;;  %v46_v9 = vld [vmem:[#allocation2 + $0x48] sm:$0xff] }
  0x2f   :  { %1003 = vmatprep.mubr.msk.bf16.mxu0 %vm1117_vm1, %v1116_v0 }
  0x36   :  { %1004 = vmatmul.mubr.msk.bf16.gmra.mxu0 %vm116_vm3, %v1060_v10 }
  0x37   :  { %1007 = vmatprep.mubr.msk.bf16.mxu0 %vm1117_vm1, %v1116_v0 }
  0x3e   :  { %1008 = vmatmul.mubr.msk.bf16.gmra.mxu0 %vm116_vm3, %v1061_v11 }
  0xce   :  { %v176_v15 = vpop.f32.mrf.mxu0 }
  0xcf   :  { %v230_v16 = vadd.f32 %v176_v15, %v37_v14 }
  0xd0   :  { %v985_v17 = vpop.f32.mrf.mxu0 }
  0xd1   :  { %244 = vst.msk [vmem:[#allocation2] sm:$0xff] %vm22_vm2, %v230_v16  ;;  %v47_v16 = vld [vmem:[#allocation2 + $0x50] sm:$0xff] }
  0xd2   :  { %v179_v19 = vpop.f32.mrf.mxu0 }
  0xd3   :  { %v231_v20 = vadd.f32 %v179_v19, %v38_v18 }
  0xd4   :  { %v986_v21 = vpop.f32.mrf.mxu0 }
  0xd5   :  { %245 = vst.msk [vmem:[#allocation2 + $0x8] sm:$0xff] %vm22_vm2, %v231_v20 }
  0xd6   :  { %v184_v23 = vpop.f32.mrf.mxu0 }
  0xd7   :  { %v232_v24 = vadd.f32 %v184_v23, %v39_v22 }
  0xd8   :  { %v989_v25 = vpop.f32.mrf.mxu0  ;;  %v261_v27 = vld [vmem:[#allocation2] sm:$0xff] }
  0xd9   :  { %246 = vst.msk [vmem:[#allocation2 + $0x10] sm:$0xff] %vm22_vm2, %v232_v24  ;;  %v1249_v31 = vadd.f32 %v1245_v28, %v261_v27  ;;  %v48_v24 = vld [vmem:[#allocation2 + $0x58] sm:$0xff] }
  0xda   :  { %v187_v29 = vpop.f32.mrf.mxu0 }
  0xdb   :  { %v233_v30 = vadd.f32 %v187_v29, %v40_v26  ;;  %v294_v37 = vmul.f32 %v1249_v31, %v1249_v31 }
  0xdc   :  { %v262_v32 = vld [vmem:[#allocation2 + $0x8] sm:$0xff]  ;;  %v990_v33 = vpop.f32.mrf.mxu0 }
  0xdd   :  { %247 = vst.msk [vmem:[#allocation2 + $0x18] sm:$0xff] %vm22_vm2, %v233_v30  ;;  %v1253_v35 = vadd.f32 %v1245_v28, %v262_v32  ;;  %v49_v33 = vld [vmem:[#allocation2 + $0x60] sm:$0x3] }
  0xde   :  { %v192_v36 = vpop.f32.mrf.mxu0 }
  0xdf   :  { %v295_v38 = vmul.f32 %v1253_v35, %v1253_v35  ;;  %v234_v39 = vadd.f32 %v192_v36, %v41_v34 }
  0xe0   :  { %v263_v40 = vld [vmem:[#allocation2 + $0x10] sm:$0xff]  ;;  %v993_v41 = vpop.f32.mrf.mxu0 }
  0xe1   :  { %v307_v43 = vpack.c.bf16 %v295_v38, %v294_v37  ;;  %v1260_v44 = vadd.f32 %v1245_v28, %v263_v40  ;;  %248 = vst.msk [vmem:[#allocation2 + $0x20] sm:$0xff] %vm22_vm2, %v234_v39 }
  0xe2   :  { %v195_v45 = vpop.f32.mrf.mxu0 }
  0xe3   :  { %1016 = vmatmul.mubr.msk.bf16.vlgmr.msra.gmra.mxu1 %vm22_vm2, %v307_v43  ;;  %v235_v46 = vadd.f32 %v195_v45, %v42_v42  ;;  %v296_v51 = vmul.f32 %v1260_v44, %v1260_v44 }
  0xe4   :  { %1019 = vmatprep.mubr.msk.bf16.mxu1 %vm1117_vm1, %v1116_v0  ;;  %v264_v47 = vld [vmem:[#allocation2 + $0x18] sm:$0xff]  ;;  %v994_v48 = vpop.f32.mrf.mxu0 }
  0xe5   :  { %v1267_v50 = vadd.f32 %v1245_v28, %v264_v47  ;;  %249 = vst.msk [vmem:[#allocation2 + $0x28] sm:$0xff] %vm22_vm2, %v235_v46 }
  0xe6   :  { %v200_v52 = vpop.f32.mrf.mxu0 }
  0xe7   :  { %v297_v53 = vmul.f32 %v1267_v50, %v1267_v50  ;;  %v236_v54 = vadd.f32 %v200_v52, %v43_v49 }
  0xe8   :  { %v265_v55 = vld [vmem:[#allocation2 + $0x20] sm:$0xff]  ;;  %v997_v56 = vpop.f32.mrf.mxu0 }
  0xe9   :  { %v308_v58 = vpack.c.bf16 %v297_v53, %v296_v51  ;;  %v1275_v59 = vadd.f32 %v1245_v28, %v265_v55  ;;  %250 = vst.msk [vmem:[#allocation2 + $0x30] sm:$0xff] %vm22_vm2, %v236_v54 }
  0xea   :  { %v203_v60 = vpop.f32.mrf.mxu0 }
  0xeb   :  { %1020 = vmatmul.mubr.msk.bf16.gmra.mxu1 %vm22_vm2, %v308_v58  ;;  %v237_v61 = vadd.f32 %v203_v60, %v44_v57  ;;  %v298_v3 = vmul.f32 %v1275_v59, %v1275_v59 }
  0xec   :  { %1023 = vmatprep.mubr.msk.bf16.mxu1 %vm1117_vm1, %v1116_v0  ;;  %v266_v62 = vld [vmem:[#allocation2 + $0x28] sm:$0xff]  ;;  %v998_v63 = vpop.f32.mrf.mxu0 }
  0xed   :  { %v1282_v2 = vadd.f32 %v1245_v28, %v266_v62  ;;  %251 = vst.msk [vmem:[#allocation2 + $0x38] sm:$0xff] %vm22_vm2, %v237_v61 }
  0xee   :  { %v208_v4 = vpop.f32.mrf.mxu0 }
  0xef   :  { %v299_v5 = vmul.f32 %v1282_v2, %v1282_v2  ;;  %v238_v6 = vadd.f32 %v208_v4, %v45_v1 }
  0xf0   :  { %v267_v7 = vld [vmem:[#allocation2 + $0x30] sm:$0xff]  ;;  %v1001_v8 = vpop.f32.mrf.mxu0 }
  0xf1   :  { %v309_v10 = vpack.c.bf16 %v299_v5, %v298_v3  ;;  %v1290_v11 = vadd.f32 %v1245_v28, %v267_v7  ;;  %252 = vst.msk [vmem:[#allocation2 + $0x40] sm:$0xff] %vm22_vm2, %v238_v6 }
  0xf2   :  { %v211_v12 = vpop.f32.mrf.mxu0 }
  0xf3   :  { %1024 = vmatmul.mubr.msk.bf16.gmra.mxu1 %vm22_vm2, %v309_v10  ;;  %v239_v13 = vadd.f32 %v211_v12, %v46_v9  ;;  %v300_v18 = vmul.f32 %v1290_v11, %v1290_v11 }
  0xf4   :  { %1027 = vmatprep.mubr.msk.bf16.mxu1 %vm1117_vm1, %v1116_v0  ;;  %v268_v14 = vld [vmem:[#allocation2 + $0x38] sm:$0xff]  ;;  %v1002_v15 = vpop.f32.mrf.mxu0 }
  0xf5   :  { %v1297_v17 = vadd.f32 %v1245_v28, %v268_v14  ;;  %253 = vst.msk [vmem:[#allocation2 + $0x48] sm:$0xff] %vm22_vm2, %v239_v13 }
  0xf6   :  { %v216_v19 = vpop.f32.mrf.mxu0 }
  0xf7   :  { %v301_v20 = vmul.f32 %v1297_v17, %v1297_v17  ;;  %v240_v21 = vadd.f32 %v216_v19, %v47_v16 }
  0xf8   :  { %v269_v22 = vld [vmem:[#allocation2 + $0x40] sm:$0xff]  ;;  %v1005_v23 = vpop.f32.mrf.mxu0 }
  0xf9   :  { %v310_v25 = vpack.c.bf16 %v301_v20, %v300_v18  ;;  %v1305_v26 = vadd.f32 %v1245_v28, %v269_v22  ;;  %254 = vst.msk [vmem:[#allocation2 + $0x50] sm:$0xff] %vm22_vm2, %v240_v21 }
  0xfa   :  { %v219_v27 = vpop.f32.mrf.mxu0 }
  0xfb   :  { %1028 = vmatmul.mubr.msk.bf16.gmra.mxu1 %vm22_vm2, %v310_v25  ;;  %v241_v29 = vadd.f32 %v219_v27, %v48_v24  ;;  %v302_v36 = vmul.f32 %v1305_v26, %v1305_v26 }
  0xfc   :  { %1031 = vmatprep.mubr.msk.bf16.mxu1 %vm1117_vm1, %v1116_v0  ;;  %v270_v30 = vld [vmem:[#allocation2 + $0x48] sm:$0xff]  ;;  %v1006_v32 = vpop.f32.mrf.mxu0 }
  0xfd   :  { %v1312_v34 = vadd.f32 %v1245_v28, %v270_v30  ;;  %255 = vst.msk [vmem:[#allocation2 + $0x58] sm:$0xff] %vm22_vm2, %v241_v29 }
  0xfe   :  { %v224_v37 = vpop.f32.mrf.mxu0 }
  0xff   :  { %v303_v38 = vmul.f32 %v1312_v34, %v1312_v34  ;;  %v242_v39 = vadd.f32 %v224_v37, %v49_v33 }
 0x100   :  { %v271_v40 = vld [vmem:[#allocation2 + $0x50] sm:$0xff]  ;;  %v1009_v41 = vpop.f32.mrf.mxu0 }
 0x101   :  { %v311_v42 = vpack.c.bf16 %v303_v38, %v302_v36  ;;  %v1320_v43 = vadd.f32 %v1245_v28, %v271_v40  ;;  %257 = vst.msk [vmem:[#allocation2 + $0x60] sm:$0x3] %vm35_vm4, %v242_v39 }
 0x102   :  { %v227_v45 = vpop.f32.mrf.mxu0 }
 0x103   :  { %1032 = vmatmul.mubr.msk.bf16.gmra.mxu1 %vm22_vm2, %v311_v42  ;;  %v304_v49 = vmul.f32 %v1320_v43, %v1320_v43 }
 0x104   :  { %1035 = vmatprep.mubr.msk.bf16.mxu1 %vm1117_vm1, %v1116_v0  ;;  %v272_v46 = vld [vmem:[#allocation2 + $0x58] sm:$0xff]  ;;  %v1010_v47 = vpop.f32.mrf.mxu0 }
 0x105   :  { %v1327_v48 = vadd.f32 %v1245_v28, %v272_v46 }
 0x107   :  { %v305_v51 = vmul.f32 %v1327_v48, %v1327_v48 }
 0x108   :  { %v273_v52 = vld [vmem:[#allocation2 + $0x60] sm:$0x3] }
 0x109   :  { %v312_v53 = vpack.c.bf16 %v305_v51, %v304_v49  ;;  %v1334_v54 = vadd.f32 %v1245_v28, %v273_v52 }
 0x10b   :  { %1036 = vmatmul.mubr.msk.bf16.gmra.mxu1 %vm22_vm2, %v312_v53  ;;  %v306_v55 = vmul.f32 %v1334_v54, %v1334_v54 }
 0x10c   :  { %1039 = vmatprep.mubr.msk.bf16.mxu1 %vm1117_vm1, %v1116_v0 }
 0x10d   :  { %v313_v56 = vpack.c.bf16 %v306_v55, %v306_v55 }
 0x113   :  { %1040 = vmatmul.mubr.msk.bf16.gmra.mxu1 %vm22_vm2, %v313_v56 }
 0x1a3   :  { %v385_v57 = vpop.f32.mrf.mxu1 }
 0x1a4   :  { %v439_v58 = vadd.f32 1e-07, %v385_v57  ;;  %v478_v60 = vadd.f32 1.0, %v385_v57 }
 0x1a5   :  { %v1017_v61 = vpop.f32.mrf.mxu1 }
 0x1a6   :  { %1064 = vrsqrt.f32 %v439_v58 }
 0x1a7   :  { %v388_v62 = vpop.f32.mrf.mxu1  ;;  %1066 = vrcp.f32 %v478_v60 }
 0x1a8   :  { %v440_v63 = vadd.f32 1e-07, %v388_v62  ;;  %v479_v5 = vadd.f32 1.0, %v388_v62 }
 0x1a9   :  { %v1018_v28 = vpop.f32.mrf.mxu1 }
 0x1aa   :  { %1068 = vrsqrt.f32 %v440_v63 }
 0x1ab   :  { %v393_v1 = vpop.f32.mrf.mxu1  ;;  %1070 = vrcp.f32 %v479_v5 }
 0x1ac   :  { %v441_v13 = vadd.f32 1e-07, %v393_v1  ;;  %v480_v16 = vadd.f32 1.0, %v393_v1 }
 0x1ad   :  { %v1021_v3 = vpop.f32.mrf.mxu1 }
 0x1ae   :  { %1072 = vrsqrt.f32 %v441_v13 }
 0x1af   :  { %v1342_v4 = vpop.f32.mrf.mxu1  ;;  %1074 = vrcp.f32 %v480_v16 }
 0x1b0   :  { %v442_v30 = vadd.f32 1e-07, %v1342_v4  ;;  %v481_v38 = vadd.f32 1.0, %v1342_v4 }
 0x1b1   :  { %v1022_v6 = vpop.f32.mrf.mxu1 }
 0x1b2   :  { %1076 = vrsqrt.f32 %v442_v30 }
 0x1b3   :  { %v1065_v0 = vpop.eup %1064  ;;  %v1344_v7 = vpop.f32.mrf.mxu1  ;;  %1078 = vrcp.f32 %v481_v38 }
 0x1b4   :  { %v465_v8 = vmul.f32 %v1065_v0, %v385_v57  ;;  %v1067_v9 = vpop.eup %1066  ;;  %v443_v51 = vadd.f32 1e-07, %v1344_v7  ;;  %v482_v57 = vadd.f32 1.0, %v1344_v7 }
 0x1b5   :  { %v1025_v10 = vpop.f32.mrf.mxu1 }
 0x1b6   :  { %v1346_v12 = vmul.f32 %v1067_v9, %v465_v8  ;;  %1080 = vrsqrt.f32 %v443_v51 }
 0x1b7   :  { %v1348_v14 = vpop.f32.mrf.mxu1  ;;  %v1069_v18 = vpop.eup %1068  ;;  %1082 = vrcp.f32 %v482_v57 }
 0x1b8   :  { %569 = vrot.lane.b32.xlu1 %v1346_v12, %s1118_s2  ;;  %530 = vrot.lane.b32.xlu0 %v1346_v12, %s1119_s12  ;;  %v466_v21 = vmul.f32 %v1069_v18, %v388_v62  ;;  %v1071_v23 = vpop.eup %1070  ;;  %v444_v61 = vadd.f32 1e-07, %v1348_v14  ;;  %v483_v62 = vadd.f32 1.0, %v1348_v14 }
 0x1b9   :  { %v1026_v15 = vpop.f32.mrf.mxu1 }
 0x1ba   :  { %v1366_v25 = vmul.f32 %v1071_v23, %v466_v21  ;;  %1084 = vrsqrt.f32 %v444_v61 }
 0x1bb   :  { %v1354_v19 = vpop.f32.mrf.mxu1  ;;  %v1073_v32 = vpop.eup %1072  ;;  %1086 = vrcp.f32 %v483_v62 }
 0x1bc   :  { %647 = vrot.lane.b32.xlu1 %v1346_v12, %s1120_s13  ;;  %608 = vrot.lane.b32.xlu0 %v1346_v12, %s1121_s14  ;;  %v467_v37 = vmul.f32 %v1073_v32, %v393_v1  ;;  %v1075_v39 = vpop.eup %1074  ;;  %v484_v0 = vadd.f32 1.0, %v1354_v19 }
 0x1bd   :  { %v1029_v20 = vpop.f32.mrf.mxu1 }
 0x1be   :  { %v1388_v42 = vmul.f32 %v1075_v39, %v467_v37 }
 0x1bf   :  { %v1360_v22 = vpop.f32.mrf.mxu1  ;;  %v1077_v52 = vpop.eup %1076 }
 0x1c0   :  { %725 = vrot.lane.b32.xlu1 %v1346_v12, %s1122_s15  ;;  %686 = vrot.lane.b32.xlu0 %v1346_v12, %s1123_s16  ;;  %v468_v56 = vmul.f32 %v1077_v52, %v1342_v4  ;;  %v1079_v58 = vpop.eup %1078  ;;  %v445_v4 = vadd.f32 1e-07, %v1354_v19  ;;  %v446_v9 = vadd.f32 1e-07, %v1360_v22  ;;  %v485_v10 = vadd.f32 1.0, %v1360_v22 }
 0x1c1   :  { %v1030_v24 = vpop.f32.mrf.mxu1 }
 0x1c2   :  { %v1413_v60 = vmul.f32 %v1079_v58, %v468_v56  ;;  %1088 = vrsqrt.f32 %v445_v4 }
 0x1c3   :  { %v1368_v27 = vpop.f32.mrf.mxu1  ;;  %v1081_v28 = vpop.eup %1080  ;;  %1090 = vrcp.f32 %v484_v0 }
 0x1c4   :  { %764 = vrot.lane.b32.xlu0 %v1346_v12, %s1124_s17  ;;  %610 = vrot.lane.b32.xlu1 %v1366_v25, %s1121_s14  ;;  %v469_v63 = vmul.f32 %v1081_v28, %v1344_v7  ;;  %v1083_v1 = vpop.eup %1082  ;;  %1092 = vrsqrt.f32 %v446_v9  ;;  %v447_v18 = vadd.f32 1e-07, %v1368_v27  ;;  %v486_v21 = vadd.f32 1.0, %v1368_v27 }
 0x1c5   :  { %v1033_v29 = vpop.f32.mrf.mxu1  ;;  %1094 = vrcp.f32 %v485_v10 }
 0x1c6   :  { %v1434_v3 = vmul.f32 %v1083_v1, %v469_v63  ;;  %1096 = vrsqrt.f32 %v447_v18 }
 0x1c7   :  { %v1375_v33 = vpop.f32.mrf.mxu1  ;;  %v1085_v5 = vpop.eup %1084  ;;  %1098 = vrcp.f32 %v486_v21 }
 0x1c8   :  { %688 = vrot.lane.b32.xlu1 %v1366_v25, %s1123_s16  ;;  %532 = vrot.lane.b32.xlu0 %v1366_v25, %s1119_s12  ;;  %v470_v6 = vmul.f32 %v1085_v5, %v1348_v14  ;;  %v1087_v7 = vpop.eup %1086  ;;  %v487_v29 = vadd.f32 1.0, %v1375_v33 }
 0x1c9   :  { %v1034_v36 = vpop.f32.mrf.mxu1 }
 0x1ca   :  { %v1451_v8 = vmul.f32 %v1087_v7, %v470_v6 }
 0x1cb   :  { %v1382_v40 = vpop.f32.mrf.mxu1 }
 0x1cc   :  { %766 = vrot.lane.b32.xlu1 %v1366_v25, %s1124_s17  ;;  %571 = vrot.lane.b32.xlu0 %v1366_v25, %s1118_s2  ;;  %v449_v38 = vadd.f32 1e-07, %v1382_v40  ;;  %v488_v51 = vadd.f32 1.0, %v1382_v40 }
 0x1cd   :  { %v1037_v41 = vpop.f32.mrf.mxu1 }
 0x1cf   :  { %v1390_v45 = vpop.f32.mrf.mxu1  ;;  %v1089_v13 = vpop.eup %1088 }
 0x1d0   :  { %649 = vrot.lane.b32.xlu0 %v1366_v25, %s1120_s13  ;;  %534 = vrot.lane.b32.xlu1 %v1388_v42, %s1119_s12  ;;  %v471_v14 = vmul.f32 %v1089_v13, %v1354_v19  ;;  %v1091_v15 = vpop.eup %1090  ;;  %v450_v28 = vadd.f32 1e-07, %v1390_v45  ;;  %v489_v0 = vadd.f32 1.0, %v1390_v45 }
 0x1d1   :  { %v1038_v46 = vpop.f32.mrf.mxu1  ;;  %v1093_v20 = vpop.eup %1092 }
 0x1d2   :  { %v1472_v16 = vmul.f32 %v1091_v15, %v471_v14  ;;  %v472_v19 = vmul.f32 %v1093_v20, %v1360_v22  ;;  %v1095_v23 = vpop.eup %1094  ;;  %v448_v22 = vadd.f32 1e-07, %v1375_v33 }
 0x1d3   :  { %v1396_v47 = vpop.f32.mrf.mxu1  ;;  %v1097_v30 = vpop.eup %1096 }
 0x1d4   :  { %727 = vrot.lane.b32.xlu0 %v1366_v25, %s1122_s15  ;;  %573 = vrot.lane.b32.xlu1 %v1388_v42, %s1118_s2  ;;  %v1489_v24 = vmul.f32 %v1095_v23, %v472_v19  ;;  %1100 = vrsqrt.f32 %v448_v22  ;;  %v473_v32 = vmul.f32 %v1097_v30, %v1368_v27  ;;  %v1099_v36 = vpop.eup %1098  ;;  %v451_v21 = vadd.f32 1e-07, %v1396_v47 }
 0x1d5   :  { %v1041_v49 = vpop.f32.mrf.mxu1  ;;  %1102 = vrcp.f32 %v487_v29  ;;  %v490_v29 = vadd.f32 1.0, %v1396_v47 }
 0x1d6   :  { %v1510_v37 = vmul.f32 %v1099_v36, %v473_v32  ;;  %1104 = vrsqrt.f32 %v449_v38 }
 0x1d7   :  { %v436_v53 = vpop.f32.mrf.mxu1  ;;  %1106 = vrcp.f32 %v488_v51 }
 0x1d8   :  { %612 = vrot.lane.b32.xlu0 %v1388_v42, %s1121_s14  ;;  %651 = vrot.lane.b32.xlu1 %v1388_v42, %s1120_s13  ;;  %1108 = vrsqrt.f32 %v450_v28 }
 0x1d9   :  { %v1042_v55 = vpop.f32.mrf.mxu1  ;;  %1110 = vrcp.f32 %v489_v0 }
 0x1da   :  { %1112 = vrsqrt.f32 %v451_v21 }
 0x1db   :  { %1114 = vrcp.f32 %v490_v29 }
 0x1dc   :  { %690 = vrot.lane.b32.xlu0 %v1388_v42, %s1123_s16  ;;  %729 = vrot.lane.b32.xlu1 %v1388_v42, %s1122_s15 }
 0x1e0   :  { %768 = vrot.lane.b32.xlu0 %v1388_v42, %s1124_s17  ;;  %536 = vrot.lane.b32.xlu1 %v1413_v60, %s1119_s12 }
 0x1e1   :  { %v1101_v41 = vpop.eup %1100 }
 0x1e2   :  { %v474_v49 = vmul.f32 %v1101_v41, %v1375_v33  ;;  %v1103_v56 = vpop.eup %1102 }
 0x1e3   :  { %v1105_v10 = vpop.eup %1104 }
 0x1e4   :  { %575 = vrot.lane.b32.xlu0 %v1413_v60, %s1118_s2  ;;  %614 = vrot.lane.b32.xlu1 %v1413_v60, %s1121_s14  ;;  %v1531_v57 = vmul.f32 %v1103_v56, %v474_v49  ;;  %v1107_v18 = vpop.eup %1106 }
 0x1e5   :  { %v1109_v38 = vpop.eup %1108 }
 0x1e6   :  { %v476_v49 = vmul.f32 %v1109_v38, %v1390_v45 }
 0x1e8   :  { %653 = vrot.lane.b32.xlu0 %v1413_v60, %s1120_s13  ;;  %692 = vrot.lane.b32.xlu1 %v1413_v60, %s1123_s16 }
 0x1ec   :  { %731 = vrot.lane.b32.xlu0 %v1413_v60, %s1122_s15  ;;  %770 = vrot.lane.b32.xlu1 %v1413_v60, %s1124_s17 }
 0x1f0   :  { %577 = vrot.lane.b32.xlu1 %v1434_v3, %s1118_s2  ;;  %538 = vrot.lane.b32.xlu0 %v1434_v3, %s1119_s12 }
 0x1f4   :  { %655 = vrot.lane.b32.xlu1 %v1434_v3, %s1120_s13  ;;  %616 = vrot.lane.b32.xlu0 %v1434_v3, %s1121_s14 }
 0x1f8   :  { %733 = vrot.lane.b32.xlu1 %v1434_v3, %s1122_s15  ;;  %694 = vrot.lane.b32.xlu0 %v1434_v3, %s1123_s16 }
 0x1fc   :  { %772 = vrot.lane.b32.xlu0 %v1434_v3, %s1124_s17  ;;  %540 = vrot.lane.b32.xlu1 %v1451_v8, %s1119_s12 }
 0x200   :  { %579 = vrot.lane.b32.xlu0 %v1451_v8, %s1118_s2  ;;  %618 = vrot.lane.b32.xlu1 %v1451_v8, %s1121_s14 }
 0x204   :  { %657 = vrot.lane.b32.xlu0 %v1451_v8, %s1120_s13  ;;  %696 = vrot.lane.b32.xlu1 %v1451_v8, %s1123_s16 }
 0x208   :  { %735 = vrot.lane.b32.xlu0 %v1451_v8, %s1122_s15  ;;  %774 = vrot.lane.b32.xlu1 %v1451_v8, %s1124_s17 }
 0x20c   :  { %581 = vrot.lane.b32.xlu1 %v1472_v16, %s1118_s2  ;;  %542 = vrot.lane.b32.xlu0 %v1472_v16, %s1119_s12 }
 0x210   :  { %659 = vrot.lane.b32.xlu1 %v1472_v16, %s1120_s13  ;;  %620 = vrot.lane.b32.xlu0 %v1472_v16, %s1121_s14 }
 0x214   :  { %737 = vrot.lane.b32.xlu1 %v1472_v16, %s1122_s15  ;;  %698 = vrot.lane.b32.xlu0 %v1472_v16, %s1123_s16 }
 0x218   :  { %776 = vrot.lane.b32.xlu0 %v1472_v16, %s1124_s17  ;;  %544 = vrot.lane.b32.xlu1 %v1489_v24, %s1119_s12 }
 0x21c   :  { %583 = vrot.lane.b32.xlu0 %v1489_v24, %s1118_s2  ;;  %622 = vrot.lane.b32.xlu1 %v1489_v24, %s1121_s14 }
 0x220   :  { %661 = vrot.lane.b32.xlu0 %v1489_v24, %s1120_s13  ;;  %700 = vrot.lane.b32.xlu1 %v1489_v24, %s1123_s16 }
 0x224   :  { %739 = vrot.lane.b32.xlu0 %v1489_v24, %s1122_s15  ;;  %778 = vrot.lane.b32.xlu1 %v1489_v24, %s1124_s17 }
 0x228   :  { %585 = vrot.lane.b32.xlu1 %v1510_v37, %s1118_s2  ;;  %546 = vrot.lane.b32.xlu0 %v1510_v37, %s1119_s12 }
 0x22a   :  { %v570_v27 = vpop.permute.xlu1 %569  ;;  %v531_v39 = vpop.permute.xlu0 %530 }
 0x22b   :  { %v804_v46 = vsel %vm803_vm5, %v1346_v12, %v531_v39 }
 0x22c   :  { %663 = vrot.lane.b32.xlu1 %v1510_v37, %s1120_s13  ;;  %624 = vrot.lane.b32.xlu0 %v1510_v37, %s1121_s14  ;;  %v818_v53 = vsel %vm817_vm6, %v804_v46, %v570_v27 }
 0x22e   :  { %v648_v52 = vpop.permute.xlu1 %647  ;;  %v609_v55 = vpop.permute.xlu0 %608 }
 0x22f   :  { %v832_v12 = vsel %vm831_vm7, %v818_v53, %v609_v55  ;;  %v1111_v55 = vpop.eup %1110 }
 0x230   :  { %741 = vrot.lane.b32.xlu1 %v1510_v37, %s1122_s15  ;;  %702 = vrot.lane.b32.xlu0 %v1510_v37, %s1123_s16  ;;  %v846_v58 = vsel %vm845_vm8, %v832_v12, %v648_v52  ;;  %v1113_v28 = vpop.eup %1112 }
 0x232   :  { %v726_v33 = vpop.permute.xlu1 %725  ;;  %v687_v61 = vpop.permute.xlu0 %686 }
 0x233   :  { %v860_v62 = vsel %vm859_vm9, %v846_v58, %v687_v61 }
 0x234   :  { %780 = vrot.lane.b32.xlu0 %v1510_v37, %s1124_s17  ;;  %548 = vrot.lane.b32.xlu1 %v1531_v57, %s1119_s12  ;;  %v874_v63 = vsel %vm873_vm10, %v860_v62, %v726_v33 }
 0x236   :  { %v765_v1 = vpop.permute.xlu0 %764  ;;  %v611_v4 = vpop.permute.xlu1 %610 }
 0x237   :  { %v888_v5 = vsel %vm887_vm11, %v874_v63, %v765_v1 }
 0x238   :  { %v901_v6 = vmul.f32 %v888_v5, %v1249_v31  ;;  %587 = vrot.lane.b32.xlu0 %v1531_v57, %s1118_s2  ;;  %626 = vrot.lane.b32.xlu1 %v1531_v57, %s1121_s14  ;;  %v475_v31 = vmul.f32 %v1105_v10, %v1382_v40 }
 0x23a   :  { %914 = vst.msk [vmem:[%s1773_s4] sm:$0xff] %vm22_vm2, %v901_v6  ;;  %v689_v7 = vpop.permute.xlu1 %688  ;;  %v533_v9 = vpop.permute.xlu0 %532  ;;  %v1564_v19 = vmul.f32 %v1107_v18, %v475_v31 }
 0x23b   :  { %v805_v13 = vsel %vm803_vm5, %v1366_v25, %v533_v9 }
 0x23c   :  { %665 = vrot.lane.b32.xlu0 %v1531_v57, %s1120_s13  ;;  %704 = vrot.lane.b32.xlu1 %v1531_v57, %s1123_s16 }
 0x23e   :  { %v767_v14 = vpop.permute.xlu1 %766  ;;  %v572_v15 = vpop.permute.xlu0 %571 }
 0x23f   :  { %v819_v20 = vsel %vm817_vm6, %v805_v13, %v572_v15 }
 0x240   :  { %743 = vrot.lane.b32.xlu0 %v1531_v57, %s1122_s15  ;;  %782 = vrot.lane.b32.xlu1 %v1531_v57, %s1124_s17  ;;  %v833_v40 = vsel %vm831_vm7, %v819_v20, %v611_v4  ;;  %v477_v4 = vmul.f32 %v1113_v28, %v1396_v47 }
 0x242   :  { %v650_v23 = vpop.permute.xlu0 %649  ;;  %v535_v22 = vpop.permute.xlu1 %534 }
 0x243   :  { %v847_v25 = vsel %vm845_vm8, %v833_v40, %v650_v23  ;;  %v806_v41 = vsel %vm803_vm5, %v1388_v42, %v535_v22 }
 0x244   :  { %589 = vrot.lane.b32.xlu1 %v1564_v19, %s1118_s2  ;;  %550 = vrot.lane.b32.xlu0 %v1564_v19, %s1119_s12  ;;  %v861_v30 = vsel %vm859_vm9, %v847_v25, %v689_v7  ;;  %v1115_v7 = vpop.eup %1114 }
 0x245   :  { %v1622_v47 = vmul.f32 %v1115_v7, %v477_v4 }
 0x246   :  { %v728_v32 = vpop.permute.xlu0 %727  ;;  %v574_v36 = vpop.permute.xlu1 %573 }
 0x247   :  { %v875_v27 = vsel %vm873_vm10, %v861_v30, %v728_v32  ;;  %v820_v51 = vsel %vm817_vm6, %v806_v41, %v574_v36 }
 0x248   :  { %v889_v39 = vsel %vm887_vm11, %v875_v27, %v767_v14  ;;  %667 = vrot.lane.b32.xlu1 %v1564_v19, %s1120_s13  ;;  %628 = vrot.lane.b32.xlu0 %v1564_v19, %s1121_s14 }
 0x249   :  { %v902_v46 = vmul.f32 %v889_v39, %v1253_v35  ;;  %v1595_v35 = vmul.f32 %v1111_v55, %v476_v49 }
 0x24a   :  { %v613_v52 = vpop.permute.xlu0 %612  ;;  %v652_v53 = vpop.permute.xlu1 %651 }
 0x24b   :  { %915 = vst.msk [vmem:[%s1773_s4 + $0x8] sm:$0xff] %vm22_vm2, %v902_v46  ;;  %v834_v56 = vsel %vm831_vm7, %v820_v51, %v613_v52 }
 0x24c   :  { %745 = vrot.lane.b32.xlu1 %v1564_v19, %s1122_s15  ;;  %706 = vrot.lane.b32.xlu0 %v1564_v19, %s1123_s16  ;;  %v848_v42 = vsel %vm845_vm8, %v834_v56, %v652_v53 }
 0x24e   :  { %v691_v45 = vpop.permute.xlu0 %690  ;;  %v730_v12 = vpop.permute.xlu1 %729 }
 0x24f   :  { %v862_v33 = vsel %vm859_vm9, %v848_v42, %v691_v45 }
 0x250   :  { %784 = vrot.lane.b32.xlu0 %v1564_v19, %s1124_s17  ;;  %552 = vrot.lane.b32.xlu1 %v1595_v35, %s1119_s12  ;;  %v876_v58 = vsel %vm873_vm10, %v862_v33, %v730_v12 }
 0x252   :  { %v769_v61 = vpop.permute.xlu0 %768  ;;  %v537_v62 = vpop.permute.xlu1 %536 }
 0x253   :  { %v890_v63 = vsel %vm887_vm11, %v876_v58, %v769_v61  ;;  %v807_v5 = vsel %vm803_vm5, %v1413_v60, %v537_v62 }
 0x254   :  { %v903_v1 = vmul.f32 %v890_v63, %v1260_v44  ;;  %591 = vrot.lane.b32.xlu0 %v1595_v35, %s1118_s2  ;;  %630 = vrot.lane.b32.xlu1 %v1595_v35, %s1121_s14 }
 0x256   :  { %916 = vst.msk [vmem:[%s1773_s4 + $0x10] sm:$0xff] %vm22_vm2, %v903_v1  ;;  %v576_v6 = vpop.permute.xlu0 %575  ;;  %v615_v0 = vpop.permute.xlu1 %614 }
 0x257   :  { %v821_v44 = vsel %vm817_vm6, %v807_v5, %v576_v6 }
 0x258   :  { %669 = vrot.lane.b32.xlu0 %v1595_v35, %s1120_s13  ;;  %708 = vrot.lane.b32.xlu1 %v1595_v35, %s1123_s16  ;;  %v835_v9 = vsel %vm831_vm7, %v821_v44, %v615_v0 }
 0x25a   :  { %v654_v10 = vpop.permute.xlu0 %653  ;;  %v693_v31 = vpop.permute.xlu1 %692 }
 0x25b   :  { %v849_v13 = vsel %vm845_vm8, %v835_v9, %v654_v10 }
 0x25c   :  { %747 = vrot.lane.b32.xlu0 %v1595_v35, %s1122_s15  ;;  %593 = vrot.lane.b32.xlu1 %v1622_v47, %s1118_s2  ;;  %v863_v60 = vsel %vm859_vm9, %v849_v13, %v693_v31 }
 0x25e   :  { %v732_v14 = vpop.permute.xlu0 %731  ;;  %v771_v15 = vpop.permute.xlu1 %770 }
 0x25f   :  { %v877_v18 = vsel %vm873_vm10, %v863_v60, %v732_v14 }
 0x260   :  { %v891_v20 = vsel %vm887_vm11, %v877_v18, %v771_v15  ;;  %671 = vrot.lane.b32.xlu1 %v1622_v47, %s1120_s13  ;;  %554 = vrot.lane.b32.xlu0 %v1622_v47, %s1119_s12 }
 0x261   :  { %v904_v21 = vmul.f32 %v891_v20, %v1267_v50 }
 0x262   :  { %v578_v40 = vpop.permute.xlu1 %577  ;;  %v539_v23 = vpop.permute.xlu0 %538 }
 0x263   :  { %917 = vst.msk [vmem:[%s1773_s4 + $0x18] sm:$0xff] %vm22_vm2, %v904_v21  ;;  %v808_v22 = vsel %vm803_vm5, %v1434_v3, %v539_v23 }
 0x264   :  { %749 = vrot.lane.b32.xlu1 %v1622_v47, %s1122_s15  ;;  %632 = vrot.lane.b32.xlu0 %v1622_v47, %s1121_s14  ;;  %v822_v29 = vsel %vm817_vm6, %v808_v22, %v578_v40 }
 0x266   :  { %v656_v25 = vpop.permute.xlu1 %655  ;;  %v617_v50 = vpop.permute.xlu0 %616 }
 0x267   :  { %v836_v30 = vsel %vm831_vm7, %v822_v29, %v617_v50 }
 0x268   :  { %786 = vrot.lane.b32.xlu1 %v1595_v35, %s1124_s17  ;;  %710 = vrot.lane.b32.xlu0 %v1622_v47, %s1123_s16  ;;  %v850_v3 = vsel %vm845_vm8, %v836_v30, %v656_v25 }
 0x26a   :  { %v734_v32 = vpop.permute.xlu1 %733  ;;  %v695_v36 = vpop.permute.xlu0 %694 }
 0x26b   :  { %v864_v38 = vsel %vm859_vm9, %v850_v3, %v695_v36 }
 0x26c   :  { %788 = vrot.lane.b32.xlu0 %v1622_v47, %s1124_s17  ;;  %v878_v27 = vsel %vm873_vm10, %v864_v38, %v734_v32 }
 0x26e   :  { %v773_v39 = vpop.permute.xlu0 %772  ;;  %v541_v41 = vpop.permute.xlu1 %540 }
 0x26f   :  { %v892_v46 = vsel %vm887_vm11, %v878_v27, %v773_v39  ;;  %v809_v51 = vsel %vm803_vm5, %v1451_v8, %v541_v41 }
 0x270   :  { %v905_v49 = vmul.f32 %v892_v46, %v1275_v59 }
 0x272   :  { %918 = vst.msk [vmem:[%s1773_s4 + $0x20] sm:$0xff] %vm22_vm2, %v905_v49  ;;  %v580_v52 = vpop.permute.xlu0 %579  ;;  %v619_v53 = vpop.permute.xlu1 %618 }
 0x273   :  { %v823_v55 = vsel %vm817_vm6, %v809_v51, %v580_v52 }
 0x274   :  { %v837_v56 = vsel %vm831_vm7, %v823_v55, %v619_v53 }
 0x276   :  { %v658_v42 = vpop.permute.xlu0 %657  ;;  %v697_v45 = vpop.permute.xlu1 %696 }
 0x277   :  { %v851_v12 = vsel %vm845_vm8, %v837_v56, %v658_v42 }
 0x278   :  { %v865_v59 = vsel %vm859_vm9, %v851_v12, %v697_v45 }
 0x27a   :  { %v736_v33 = vpop.permute.xlu0 %735  ;;  %v775_v58 = vpop.permute.xlu1 %774 }
 0x27b   :  { %v879_v61 = vsel %vm873_vm10, %v865_v59, %v736_v33 }
 0x27c   :  { %v893_v62 = vsel %vm887_vm11, %v879_v61, %v775_v58 }
 0x27d   :  { %v906_v8 = vmul.f32 %v893_v62, %v1282_v2 }
 0x27e   :  { %v582_v28 = vpop.permute.xlu1 %581  ;;  %v543_v63 = vpop.permute.xlu0 %542 }
 0x27f   :  { %919 = vst.msk [vmem:[%s1773_s4 + $0x28] sm:$0xff] %vm22_vm2, %v906_v8  ;;  %v810_v1 = vsel %vm803_vm5, %v1472_v16, %v543_v63 }
 0x280   :  { %v824_v5 = vsel %vm817_vm6, %v810_v1, %v582_v28 }
 0x282   :  { %v660_v4 = vpop.permute.xlu1 %659  ;;  %v621_v6 = vpop.permute.xlu0 %620 }
 0x283   :  { %v838_v0 = vsel %vm831_vm7, %v824_v5, %v621_v6 }
 0x284   :  { %v852_v44 = vsel %vm845_vm8, %v838_v0, %v660_v4 }
 0x286   :  { %v738_v7 = vpop.permute.xlu1 %737  ;;  %v699_v2 = vpop.permute.xlu0 %698 }
 0x287   :  { %v866_v9 = vsel %vm859_vm9, %v852_v44, %v699_v2 }
 0x288   :  { %v880_v10 = vsel %vm873_vm10, %v866_v9, %v738_v7 }
 0x28a   :  { %v777_v31 = vpop.permute.xlu0 %776  ;;  %v545_v13 = vpop.permute.xlu1 %544 }
 0x28b   :  { %v894_v60 = vsel %vm887_vm11, %v880_v10, %v777_v31  ;;  %v811_v14 = vsel %vm803_vm5, %v1489_v24, %v545_v13 }
 0x28c   :  { %v907_v16 = vmul.f32 %v894_v60, %v1290_v11 }
 0x28e   :  { %920 = vst.msk [vmem:[%s1773_s4 + $0x30] sm:$0xff] %vm22_vm2, %v907_v16  ;;  %v584_v15 = vpop.permute.xlu0 %583  ;;  %v623_v18 = vpop.permute.xlu1 %622 }
 0x28f   :  { %v825_v20 = vsel %vm817_vm6, %v811_v14, %v584_v15 }
 0x290   :  { %v839_v21 = vsel %vm831_vm7, %v825_v20, %v623_v18 }
 0x292   :  { %v662_v40 = vpop.permute.xlu0 %661  ;;  %v701_v23 = vpop.permute.xlu1 %700 }
 0x293   :  { %v853_v22 = vsel %vm845_vm8, %v839_v21, %v662_v40 }
 0x294   :  { %v867_v11 = vsel %vm859_vm9, %v853_v22, %v701_v23 }
 0x296   :  { %v740_v25 = vpop.permute.xlu0 %739  ;;  %v779_v29 = vpop.permute.xlu1 %778 }
 0x297   :  { %v881_v50 = vsel %vm873_vm10, %v867_v11, %v740_v25 }
 0x298   :  { %v895_v30 = vsel %vm887_vm11, %v881_v50, %v779_v29 }
 0x299   :  { %v908_v24 = vmul.f32 %v895_v30, %v1297_v17 }
 0x29a   :  { %v586_v32 = vpop.permute.xlu1 %585  ;;  %v547_v3 = vpop.permute.xlu0 %546 }
 0x29b   :  { %921 = vst.msk [vmem:[%s1773_s4 + $0x38] sm:$0xff] %vm22_vm2, %v908_v24  ;;  %v812_v36 = vsel %vm803_vm5, %v1510_v37, %v547_v3 }
 0x29c   :  { %v826_v27 = vsel %vm817_vm6, %v812_v36, %v586_v32 }
 0x29e   :  { %v664_v38 = vpop.permute.xlu1 %663  ;;  %v625_v39 = vpop.permute.xlu0 %624 }
 0x29f   :  { %v840_v41 = vsel %vm831_vm7, %v826_v27, %v625_v39 }
 0x2a0   :  { %v854_v49 = vsel %vm845_vm8, %v840_v41, %v664_v38 }
 0x2a2   :  { %v742_v46 = vpop.permute.xlu1 %741  ;;  %v703_v17 = vpop.permute.xlu0 %702 }
 0x2a3   :  { %v868_v51 = vsel %vm859_vm9, %v854_v49, %v703_v17 }
 0x2a4   :  { %v882_v52 = vsel %vm873_vm10, %v868_v51, %v742_v46 }
 0x2a6   :  { %v781_v53 = vpop.permute.xlu0 %780  ;;  %v549_v55 = vpop.permute.xlu1 %548 }
 0x2a7   :  { %v896_v56 = vsel %vm887_vm11, %v882_v52, %v781_v53  ;;  %v813_v42 = vsel %vm803_vm5, %v1531_v57, %v549_v55 }
 0x2a8   :  { %v909_v37 = vmul.f32 %v896_v56, %v1305_v26 }
 0x2aa   :  { %922 = vst.msk [vmem:[%s1773_s4 + $0x40] sm:$0xff] %vm22_vm2, %v909_v37  ;;  %v588_v45 = vpop.permute.xlu0 %587  ;;  %v627_v12 = vpop.permute.xlu1 %626 }
 0x2ab   :  { %v827_v59 = vsel %vm817_vm6, %v813_v42, %v588_v45 }
 0x2ac   :  { %v841_v33 = vsel %vm831_vm7, %v827_v59, %v627_v12 }
 0x2ae   :  { %v666_v58 = vpop.permute.xlu0 %665  ;;  %v705_v61 = vpop.permute.xlu1 %704 }
 0x2af   :  { %v855_v62 = vsel %vm845_vm8, %v841_v33, %v666_v58 }
 0x2b0   :  { %v869_v26 = vsel %vm859_vm9, %v855_v62, %v705_v61 }
 0x2b2   :  { %v744_v8 = vpop.permute.xlu0 %743  ;;  %v783_v28 = vpop.permute.xlu1 %782 }
 0x2b3   :  { %v883_v63 = vsel %vm873_vm10, %v869_v26, %v744_v8 }
 0x2b4   :  { %v897_v1 = vsel %vm887_vm11, %v883_v63, %v783_v28 }
 0x2b5   :  { %v910_v57 = vmul.f32 %v897_v1, %v1312_v34 }
 0x2b6   :  { %v590_v4 = vpop.permute.xlu1 %589  ;;  %v551_v5 = vpop.permute.xlu0 %550 }
 0x2b7   :  { %923 = vst.msk [vmem:[%s1773_s4 + $0x48] sm:$0xff] %vm22_vm2, %v910_v57  ;;  %v814_v6 = vsel %vm803_vm5, %v1564_v19, %v551_v5 }
 0x2b8   :  { %v828_v7 = vsel %vm817_vm6, %v814_v6, %v590_v4 }
 0x2ba   :  { %v668_v0 = vpop.permute.xlu1 %667  ;;  %v629_v44 = vpop.permute.xlu0 %628 }
 0x2bb   :  { %v842_v2 = vsel %vm831_vm7, %v828_v7, %v629_v44 }
 0x2bc   :  { %v856_v10 = vsel %vm845_vm8, %v842_v2, %v668_v0 }
 0x2be   :  { %v746_v9 = vpop.permute.xlu1 %745  ;;  %v707_v34 = vpop.permute.xlu0 %706 }
 0x2bf   :  { %v870_v31 = vsel %vm859_vm9, %v856_v10, %v707_v34 }
 0x2c0   :  { %v884_v13 = vsel %vm873_vm10, %v870_v31, %v746_v9 }
 0x2c2   :  { %v785_v60 = vpop.permute.xlu0 %784  ;;  %v553_v16 = vpop.permute.xlu1 %552 }
 0x2c3   :  { %v898_v14 = vsel %vm887_vm11, %v884_v13, %v785_v60  ;;  %v815_v22 = vsel %vm803_vm5, %v1595_v35, %v553_v16 }
 0x2c4   :  { %v911_v19 = vmul.f32 %v898_v14, %v1320_v43 }
 0x2c6   :  { %924 = vst.msk [vmem:[%s1773_s4 + $0x50] sm:$0xff] %vm22_vm2, %v911_v19  ;;  %v592_v15 = vpop.permute.xlu0 %591  ;;  %v631_v18 = vpop.permute.xlu1 %630 }
 0x2c7   :  { %v829_v11 = vsel %vm817_vm6, %v815_v22, %v592_v15 }
 0x2c8   :  { %v843_v50 = vsel %vm831_vm7, %v829_v11, %v631_v18 }
 0x2ca   :  { %v670_v20 = vpop.permute.xlu0 %669  ;;  %v709_v21 = vpop.permute.xlu1 %708 }
 0x2cb   :  { %v857_v30 = vsel %vm845_vm8, %v843_v50, %v670_v20 }
 0x2cc   :  { %v871_v38 = vsel %vm859_vm9, %v857_v30, %v709_v21 }
 0x2ce   :  { %v748_v40 = vpop.permute.xlu0 %747  ;;  %v594_v23 = vpop.permute.xlu1 %593 }
 0x2cf   :  { %v885_v35 = vsel %vm873_vm10, %v871_v38, %v748_v40 }
 0x2d2   :  { %v672_v25 = vpop.permute.xlu1 %671  ;;  %v555_v29 = vpop.permute.xlu0 %554 }
 0x2d3   :  { %v816_v43 = vsel %vm803_vm5, %v1622_v47, %v555_v29 }
 0x2d4   :  { %v830_v32 = vsel %vm817_vm6, %v816_v43, %v594_v23 }
 0x2d6   :  { %v750_v24 = vpop.permute.xlu1 %749  ;;  %v633_v3 = vpop.permute.xlu0 %632 }
 0x2d7   :  { %v844_v36 = vsel %vm831_vm7, %v830_v32, %v633_v3 }
 0x2d8   :  { %v858_v39 = vsel %vm845_vm8, %v844_v36, %v672_v25 }
 0x2da   :  { %v787_v27 = vpop.permute.xlu1 %786  ;;  %v711_v41 = vpop.permute.xlu0 %710 }
 0x2db   :  { %v899_v47 = vsel %vm887_vm11, %v885_v35, %v787_v27  ;;  %v872_v46 = vsel %vm859_vm9, %v858_v39, %v711_v41 }
 0x2dc   :  { %v912_v49 = vmul.f32 %v899_v47, %v1327_v48  ;;  %v886_v17 = vsel %vm873_vm10, %v872_v46, %v750_v24 }
 0x2de   :  { %925 = vst.msk [vmem:[%s1773_s4 + $0x58] sm:$0xff] %vm22_vm2, %v912_v49  ;;  %v789_v51 = vpop.permute.xlu0 %788 }
 0x2df   :  { %v900_v52 = vsel %vm887_vm11, %v886_v17, %v789_v51 }
 0x2e0   :  { %v913_v53 = vmul.f32 %v900_v52, %v1334_v54 }
 0x2e2   :  { %926 = vst.msk [vmem:[%s1773_s4 + $0x60] sm:$0x3] %vm35_vm4, %v913_v53 }

</bundles_post_ra>
